<compile_context>
chip_gen: v7x
topology: tpu7x:2x2x1
jax: 0.10.0
libtpu: 0.0.40
codegen_flags: <defaults>
</compile_context>

<pallas_src>
import jax
import jax.numpy as jnp
from jax.experimental import pallas as pl
from jax.experimental.pallas import tpu as pltpu

KERNEL_SIZE = 3
PAD = (KERNEL_SIZE - 1) // 2


def _make_dense_kernel(H, W, Cin, Cout, padf):
    HW = H * W
    KS = KERNEL_SIZE

    def kernel(xp_ref, w_ref, b_ref, out_ref, patch_ref):
        # xp_ref   : (Cin, padf + H*W + padf)  flat-padded input (lane-dense)
        # w_ref    : (Cout, 9*Cin)             im2col weights
        # b_ref    : (Cout, 1)                 bias
        # out_ref  : (Cin+Cout, H*W)           concatenated output (lane-dense)
        # patch_ref: (9*Cin, H*W)              im2col scratch (VMEM)
        col = jax.lax.broadcasted_iota(jnp.int32, (1, HW), 1) % W
        not_left = col != 0          # invalid source column when dw == -1
        not_right = col != (W - 1)   # invalid source column when dw == +1

        # Build the im2col patch: 9 shifted copies of the flat input.
        for kh in range(KS):
            for kw in range(KS):
                dh, dw = kh - PAD, kw - PAD
                d = dh * W + dw
                # t[:, p] == x_flat[:, p + d] with zero fill (flat padding
                # already zero-fills the vertical out-of-bounds rows).
                t = xp_ref[:, padf + d:padf + d + HW].astype(jnp.float32)
                if dw == -1:
                    t = jnp.where(not_left, t, 0.0)
                elif dw == 1:
                    t = jnp.where(not_right, t, 0.0)
                tap = kh * KS + kw
                patch_ref[tap * Cin:(tap + 1) * Cin, :] = t

        # Single MXU matmul: (Cout, 9*Cin) @ (9*Cin, H*W), f32 accumulation.
        conv = jnp.dot(w_ref[...].astype(jnp.float32), patch_ref[...],
                       preferred_element_type=jnp.float32)
        conv = jnp.maximum(conv + b_ref[...], 0.0)

        # cat([x, relu(conv(x))], channel axis) as two disjoint slice stores.
        out_ref[:Cin, :] = xp_ref[:, padf:padf + HW]
        out_ref[Cin:, :] = conv.astype(out_ref.dtype)

    return kernel


def make_dense_forward(x_nchw, weight_oihw, bias):
    """x_nchw: (N, Cin, H, W); weight_oihw: (Cout, Cin, KS, KS); bias: (Cout,)."""
    N, Cin, H, W = x_nchw.shape
    Cout = weight_oihw.shape[0]
    HW = H * W
    padf = PAD * W + PAD             # largest |flattened shift| for a 3x3 tap
    HWp = HW + 2 * padf

    # Glue (all cheap in XLA): flatten spatial, pad the flat axis by the max
    # shift, reshape weights to im2col form. No transposes of x at all.
    x_flat = x_nchw.reshape(N, Cin, HW)
    xp = jnp.pad(x_flat, ((0, 0), (0, 0), (padf, padf)))
    w_mat = jnp.transpose(weight_oihw, (0, 2, 3, 1)).reshape(
        Cout, KERNEL_SIZE * KERNEL_SIZE * Cin)
    b2 = bias.reshape(Cout, 1).astype(jnp.float32)

    out_flat = pl.pallas_call(
        _make_dense_kernel(H, W, Cin, Cout, padf),
        out_shape=jax.ShapeDtypeStruct((N, Cin + Cout, HW), x_nchw.dtype),
        grid_spec=pltpu.PrefetchScalarGridSpec(
            num_scalar_prefetch=0,
            grid=(N,),
            in_specs=[
                pl.BlockSpec((None, Cin, HWp), lambda b: (b, 0, 0)),
                pl.BlockSpec((Cout, KERNEL_SIZE * KERNEL_SIZE * Cin),
                             lambda b: (0, 0)),
                pl.BlockSpec((Cout, 1), lambda b: (0, 0)),
            ],
            out_specs=pl.BlockSpec((None, Cin + Cout, HW),
                                   lambda b: (b, 0, 0)),
            scratch_shapes=[
                pltpu.VMEM((KERNEL_SIZE * KERNEL_SIZE * Cin, HW), jnp.float32)
            ],
        ),
        compiler_params=pltpu.CompilerParams(
            dimension_semantics=("parallel",)),
    )(xp, w_mat, b2)

    # Back to (N, Cin+Cout, H, W): cat([x, relu(conv(x))], dim=1).
    return out_flat.reshape(N, Cin + Cout, H, W)


def reference_forward(x_nchw, weight_oihw, bias):
    """Pure-JAX reference matching the PyTorch module."""
    conv = jax.lax.conv_general_dilated(
        x_nchw, weight_oihw,
        window_strides=(1, 1), padding=((PAD, PAD), (PAD, PAD)),
        dimension_numbers=("NCHW", "OIHW", "NCHW"))
    conv = conv + bias.reshape(1, -1, 1, 1)
    out = jnp.maximum(conv, 0.0)
    return jnp.concatenate([x_nchw, out], axis=1)


if __name__ == "__main__":
    # make_dense(nChannels=4, GrowthRate=8, kernel_size=3)
    N, Cin, H, W = 2, 4, 16, 16
    Cout = 8

    key = jax.random.PRNGKey(0)
    kx, kw, kb = jax.random.split(key, 3)
    x = jax.random.normal(kx, (N, Cin, H, W), dtype=jnp.float32)
    weight = jax.random.normal(kw, (Cout, Cin, KERNEL_SIZE, KERNEL_SIZE),
                               dtype=jnp.float32) * 0.1
    bias = jax.random.normal(kb, (Cout,), dtype=jnp.float32) * 0.1

    out = make_dense_forward(x, weight, bias)
    out = jax.block_until_ready(out)

    ref = reference_forward(x, weight, bias)
    assert out.shape == (N, Cin + Cout, H, W), out.shape
    assert jnp.allclose(out, ref, atol=1e-4, rtol=1e-4), "mismatch vs reference"

    print("KERNEL_OK")
</pallas_src>

<mosaic_0001>
module attributes {stable_mosaic.version = 11 : i64} {
  func.func @kernel(%arg0: i32, %arg1: memref<1x4x290xf32, #tpu.memory_space<vmem>>, %arg2: memref<8x36xf32, #tpu.memory_space<vmem>>, %arg3: memref<8x1xf32, #tpu.memory_space<vmem>>, %arg4: memref<1x12x256xf32, #tpu.memory_space<vmem>>, %arg5: memref<36x256xf32, #tpu.memory_space<vmem>>) attributes {dimension_semantics = [#tpu.dimension_semantics<parallel>], iteration_bounds = array<i64: 2>, scalar_prefetch = 0 : i64, scratch_operands = 1 : i64, tpu.core_type = #tpu.core_type<tc>, window_params = [{transform_indices = @transform_0, window_bounds = array<i64: 1, 4, 290>}, {pipeline_mode = #tpu.pipeline_mode<synchronous>, transform_indices = @transform_1, window_bounds = array<i64: 8, 36>}, {pipeline_mode = #tpu.pipeline_mode<synchronous>, transform_indices = @transform_2, window_bounds = array<i64: 8, 1>}, {transform_indices = @transform_3, window_bounds = array<i64: 1, 12, 256>}]} {
    %0 = tpu.iota {dimensions = array<i32: 1>} : vector<1x256xi32>
    %c16_i32 = arith.constant 16 : i32
    %c0_i32 = arith.constant 0 : i32
    %1 = arith.cmpi eq, %c16_i32, %c0_i32 : i32
    %c1_i32 = arith.constant 1 : i32
    %2 = arith.select %1, %c1_i32, %c16_i32 : i32
    %3 = vector.broadcast %2 : i32 to vector<1x256xi32>
    %4 = arith.remsi %0, %3 : vector<1x256xi32>
    %c0_i32_0 = arith.constant 0 : i32
    %5 = vector.broadcast %c0_i32_0 : i32 to vector<1x256xi32>
    %6 = arith.cmpi ne, %4, %5 : vector<1x256xi32>
    %c0_i32_1 = arith.constant 0 : i32
    %7 = vector.broadcast %c0_i32_1 : i32 to vector<1x256xi32>
    %8 = arith.cmpi slt, %4, %7 : vector<1x256xi32>
    %c0_i32_2 = arith.constant 0 : i32
    %9 = arith.cmpi slt, %2, %c0_i32_2 : i32
    %10 = vector.broadcast %9 : i1 to vector<1x256xi1>
    %11 = vector.broadcast %10 : vector<1x256xi1> to vector<1x256xi1>
    %12 = arith.xori %8, %11 : vector<1x256xi1>
    %13 = arith.andi %12, %6 : vector<1x256xi1>
    %14 = vector.broadcast %2 : i32 to vector<1x256xi32>
    %15 = arith.addi %4, %14 : vector<1x256xi32>
    %16 = arith.select %13, %15, %4 : vector<1x256xi1>, vector<1x256xi32>
    %c0_i32_3 = arith.constant 0 : i32
    %17 = vector.broadcast %c0_i32_3 : i32 to vector<1x256xi32>
    %18 = arith.cmpi ne, %16, %17 : vector<1x256xi32>
    %c15_i32 = arith.constant 15 : i32
    %19 = vector.broadcast %c15_i32 : i32 to vector<1x256xi32>
    %20 = arith.cmpi ne, %16, %19 : vector<1x256xi32>
    %c0 = arith.constant 0 : index
    %c0_4 = arith.constant 0 : index
    %c0_5 = arith.constant 0 : index
    %21 = vector.load %arg1[%c0, %c0_4, %c0_5] : memref<1x4x290xf32, #tpu.memory_space<vmem>>, vector<1x4x256xf32>
    %22 = vector.shape_cast %21 : vector<1x4x256xf32> to vector<4x256xf32>
    %cst = arith.constant 0.000000e+00 : f32
    %23 = vector.shape_cast %18 : vector<1x256xi1> to vector<1x256xi1>
    %24 = vector.broadcast %23 : vector<1x256xi1> to vector<4x256xi1>
    %25 = vector.broadcast %cst : f32 to vector<4x256xf32>
    %26 = arith.select %24, %22, %25 : vector<4x256xi1>, vector<4x256xf32>
    %c0_6 = arith.constant 0 : index
    %c0_7 = arith.constant 0 : index
    %27 = vector.load %arg5[%c0_6, %c0_7] : memref<36x256xf32, #tpu.memory_space<vmem>>, vector<4x256xf32>
    tpu.vector_store %arg5[%c0_6, %c0_7], %26 {strides = array<i32>} : memref<36x256xf32, #tpu.memory_space<vmem>>, vector<4x256xf32>,
    %c0_8 = arith.constant 0 : index
    %c0_9 = arith.constant 0 : index
    %c1 = arith.constant 1 : index
    %28 = vector.load %arg1[%c0_8, %c0_9, %c1] : memref<1x4x290xf32, #tpu.memory_space<vmem>>, vector<1x4x256xf32>
    %29 = vector.shape_cast %28 : vector<1x4x256xf32> to vector<4x256xf32>
    %c4 = arith.constant 4 : index
    %c0_10 = arith.constant 0 : index
    %30 = vector.load %arg5[%c4, %c0_10] : memref<36x256xf32, #tpu.memory_space<vmem>>, vector<4x256xf32>
    tpu.vector_store %arg5[%c4, %c0_10], %29 {strides = array<i32>} : memref<36x256xf32, #tpu.memory_space<vmem>>, vector<4x256xf32>,
    %c0_11 = arith.constant 0 : index
    %c0_12 = arith.constant 0 : index
    %c2 = arith.constant 2 : index
    %31 = vector.load %arg1[%c0_11, %c0_12, %c2] : memref<1x4x290xf32, #tpu.memory_space<vmem>>, vector<1x4x256xf32>
    %32 = vector.shape_cast %31 : vector<1x4x256xf32> to vector<4x256xf32>
    %cst_13 = arith.constant 0.000000e+00 : f32
    %33 = vector.shape_cast %20 : vector<1x256xi1> to vector<1x256xi1>
    %34 = vector.broadcast %33 : vector<1x256xi1> to vector<4x256xi1>
    %35 = vector.broadcast %cst_13 : f32 to vector<4x256xf32>
    %36 = arith.select %34, %32, %35 : vector<4x256xi1>, vector<4x256xf32>
    %c8 = arith.constant 8 : index
    %c0_14 = arith.constant 0 : index
    %37 = vector.load %arg5[%c8, %c0_14] : memref<36x256xf32, #tpu.memory_space<vmem>>, vector<4x256xf32>
    tpu.vector_store %arg5[%c8, %c0_14], %36 {strides = array<i32>} : memref<36x256xf32, #tpu.memory_space<vmem>>, vector<4x256xf32>,
    %c0_15 = arith.constant 0 : index
    %c0_16 = arith.constant 0 : index
    %c16 = arith.constant 16 : index
    %38 = vector.load %arg1[%c0_15, %c0_16, %c16] : memref<1x4x290xf32, #tpu.memory_space<vmem>>, vector<1x4x256xf32>
    %39 = vector.shape_cast %38 : vector<1x4x256xf32> to vector<4x256xf32>
    %cst_17 = arith.constant 0.000000e+00 : f32
    %40 = vector.shape_cast %18 : vector<1x256xi1> to vector<1x256xi1>
    %41 = vector.broadcast %40 : vector<1x256xi1> to vector<4x256xi1>
    %42 = vector.broadcast %cst_17 : f32 to vector<4x256xf32>
    %43 = arith.select %41, %39, %42 : vector<4x256xi1>, vector<4x256xf32>
    %c12 = arith.constant 12 : index
    %c0_18 = arith.constant 0 : index
    %44 = vector.load %arg5[%c12, %c0_18] : memref<36x256xf32, #tpu.memory_space<vmem>>, vector<4x256xf32>
    tpu.vector_store %arg5[%c12, %c0_18], %43 {strides = array<i32>} : memref<36x256xf32, #tpu.memory_space<vmem>>, vector<4x256xf32>,
    %c0_19 = arith.constant 0 : index
    %c0_20 = arith.constant 0 : index
    %c17 = arith.constant 17 : index
    %45 = vector.load %arg1[%c0_19, %c0_20, %c17] : memref<1x4x290xf32, #tpu.memory_space<vmem>>, vector<1x4x256xf32>
    %46 = vector.shape_cast %45 : vector<1x4x256xf32> to vector<4x256xf32>
    %c16_21 = arith.constant 16 : index
    %c0_22 = arith.constant 0 : index
    %47 = vector.load %arg5[%c16_21, %c0_22] : memref<36x256xf32, #tpu.memory_space<vmem>>, vector<4x256xf32>
    tpu.vector_store %arg5[%c16_21, %c0_22], %46 {strides = array<i32>} : memref<36x256xf32, #tpu.memory_space<vmem>>, vector<4x256xf32>,
    %c0_23 = arith.constant 0 : index
    %c0_24 = arith.constant 0 : index
    %c18 = arith.constant 18 : index
    %48 = vector.load %arg1[%c0_23, %c0_24, %c18] : memref<1x4x290xf32, #tpu.memory_space<vmem>>, vector<1x4x256xf32>
    %49 = vector.shape_cast %48 : vector<1x4x256xf32> to vector<4x256xf32>
    %cst_25 = arith.constant 0.000000e+00 : f32
    %50 = vector.shape_cast %20 : vector<1x256xi1> to vector<1x256xi1>
    %51 = vector.broadcast %50 : vector<1x256xi1> to vector<4x256xi1>
    %52 = vector.broadcast %cst_25 : f32 to vector<4x256xf32>
    %53 = arith.select %51, %49, %52 : vector<4x256xi1>, vector<4x256xf32>
    %c20 = arith.constant 20 : index
    %c0_26 = arith.constant 0 : index
    %54 = vector.load %arg5[%c20, %c0_26] : memref<36x256xf32, #tpu.memory_space<vmem>>, vector<4x256xf32>
    tpu.vector_store %arg5[%c20, %c0_26], %53 {strides = array<i32>} : memref<36x256xf32, #tpu.memory_space<vmem>>, vector<4x256xf32>,
    %c0_27 = arith.constant 0 : index
    %c0_28 = arith.constant 0 : index
    %c32 = arith.constant 32 : index
    %55 = vector.load %arg1[%c0_27, %c0_28, %c32] : memref<1x4x290xf32, #tpu.memory_space<vmem>>, vector<1x4x256xf32>
    %56 = vector.shape_cast %55 : vector<1x4x256xf32> to vector<4x256xf32>
    %cst_29 = arith.constant 0.000000e+00 : f32
    %57 = vector.shape_cast %18 : vector<1x256xi1> to vector<1x256xi1>
    %58 = vector.broadcast %57 : vector<1x256xi1> to vector<4x256xi1>
    %59 = vector.broadcast %cst_29 : f32 to vector<4x256xf32>
    %60 = arith.select %58, %56, %59 : vector<4x256xi1>, vector<4x256xf32>
    %c24 = arith.constant 24 : index
    %c0_30 = arith.constant 0 : index
    %61 = vector.load %arg5[%c24, %c0_30] : memref<36x256xf32, #tpu.memory_space<vmem>>, vector<4x256xf32>
    tpu.vector_store %arg5[%c24, %c0_30], %60 {strides = array<i32>} : memref<36x256xf32, #tpu.memory_space<vmem>>, vector<4x256xf32>,
    %c0_31 = arith.constant 0 : index
    %c0_32 = arith.constant 0 : index
    %c33 = arith.constant 33 : index
    %62 = vector.load %arg1[%c0_31, %c0_32, %c33] : memref<1x4x290xf32, #tpu.memory_space<vmem>>, vector<1x4x256xf32>
    %63 = vector.shape_cast %62 : vector<1x4x256xf32> to vector<4x256xf32>
    %c28 = arith.constant 28 : index
    %c0_33 = arith.constant 0 : index
    %64 = vector.load %arg5[%c28, %c0_33] : memref<36x256xf32, #tpu.memory_space<vmem>>, vector<4x256xf32>
    tpu.vector_store %arg5[%c28, %c0_33], %63 {strides = array<i32>} : memref<36x256xf32, #tpu.memory_space<vmem>>, vector<4x256xf32>,
    %c0_34 = arith.constant 0 : index
    %c0_35 = arith.constant 0 : index
    %c34 = arith.constant 34 : index
    %65 = vector.load %arg1[%c0_34, %c0_35, %c34] : memref<1x4x290xf32, #tpu.memory_space<vmem>>, vector<1x4x256xf32>
    %66 = vector.shape_cast %65 : vector<1x4x256xf32> to vector<4x256xf32>
    %cst_36 = arith.constant 0.000000e+00 : f32
    %67 = vector.shape_cast %20 : vector<1x256xi1> to vector<1x256xi1>
    %68 = vector.broadcast %67 : vector<1x256xi1> to vector<4x256xi1>
    %69 = vector.broadcast %cst_36 : f32 to vector<4x256xf32>
    %70 = arith.select %68, %66, %69 : vector<4x256xi1>, vector<4x256xf32>
    %c32_37 = arith.constant 32 : index
    %c0_38 = arith.constant 0 : index
    %71 = vector.load %arg5[%c32_37, %c0_38] : memref<36x256xf32, #tpu.memory_space<vmem>>, vector<4x256xf32>
    tpu.vector_store %arg5[%c32_37, %c0_38], %70 {strides = array<i32>} : memref<36x256xf32, #tpu.memory_space<vmem>>, vector<4x256xf32>,
    %c0_39 = arith.constant 0 : index
    %c0_40 = arith.constant 0 : index
    %72 = vector.load %arg2[%c0_39, %c0_40] : memref<8x36xf32, #tpu.memory_space<vmem>>, vector<8x36xf32>
    %c0_41 = arith.constant 0 : index
    %c0_42 = arith.constant 0 : index
    %73 = vector.load %arg5[%c0_41, %c0_42] : memref<36x256xf32, #tpu.memory_space<vmem>>, vector<36x256xf32>
    %cst_43 = arith.constant dense<0.000000e+00> : vector<8x256xf32>
    %74 = tpu.matmul %72, %73, %cst_43 {dimension_numbers = #tpu.dot_dimension_numbers<[1], [0], [0], [1], [0, 0, 1, 1], [], []>} : vector<8x36xf32>, vector<36x256xf32>, vector<8x256xf32> -> vector<8x256xf32>
    %c0_44 = arith.constant 0 : index
    %c0_45 = arith.constant 0 : index
    %75 = vector.load %arg3[%c0_44, %c0_45] : memref<8x1xf32, #tpu.memory_space<vmem>>, vector<8x1xf32>
    %76 = vector.broadcast %75 : vector<8x1xf32> to vector<8x256xf32>
    %77 = arith.addf %74, %76 : vector<8x256xf32>
    %cst_46 = arith.constant 0.000000e+00 : f32
    %78 = vector.broadcast %cst_46 : f32 to vector<8x256xf32>
    %79 = arith.maximumf %77, %78 : vector<8x256xf32>
    %c0_47 = arith.constant 0 : index
    %c0_48 = arith.constant 0 : index
    %c17_49 = arith.constant 17 : index
    %80 = vector.load %arg1[%c0_47, %c0_48, %c17_49] : memref<1x4x290xf32, #tpu.memory_space<vmem>>, vector<1x4x256xf32>
    %81 = vector.shape_cast %80 : vector<1x4x256xf32> to vector<4x256xf32>
    %c0_50 = arith.constant 0 : index
    %c0_51 = arith.constant 0 : index
    %c0_52 = arith.constant 0 : index
    %82 = vector.load %arg4[%c0_50, %c0_51, %c0_52] : memref<1x12x256xf32, #tpu.memory_space<vmem>>, vector<1x4x256xf32>
    %83 = vector.shape_cast %82 : vector<1x4x256xf32> to vector<4x256xf32>
    %84 = vector.shape_cast %81 : vector<4x256xf32> to vector<1x4x256xf32>
    tpu.vector_store %arg4[%c0_50, %c0_51, %c0_52], %84 {strides = array<i32>} : memref<1x12x256xf32, #tpu.memory_space<vmem>>, vector<1x4x256xf32>,
    %c0_53 = arith.constant 0 : index
    %c4_54 = arith.constant 4 : index
    %c0_55 = arith.constant 0 : index
    %85 = vector.load %arg4[%c0_53, %c4_54, %c0_55] : memref<1x12x256xf32, #tpu.memory_space<vmem>>, vector<1x8x256xf32>
    %86 = vector.shape_cast %85 : vector<1x8x256xf32> to vector<8x256xf32>
    %87 = vector.shape_cast %79 : vector<8x256xf32> to vector<1x8x256xf32>
    tpu.vector_store %arg4[%c0_53, %c4_54, %c0_55], %87 {strides = array<i32>} : memref<1x12x256xf32, #tpu.memory_space<vmem>>, vector<1x8x256xf32>,
    return
  }
  func.func @transform_0(%arg0: i32) -> (i32, i32, i32) {
    %c0_i32 = arith.constant 0 : i32
    %c0_i32_0 = arith.constant 0 : i32
    %c0_i32_1 = arith.constant 0 : i32
    return %arg0, %c0_i32, %c0_i32_0 : i32, i32, i32
  }
  func.func @transform_1(%arg0: i32) -> (i32, i32) {
    %c0_i32 = arith.constant 0 : i32
    %c0_i32_0 = arith.constant 0 : i32
    %c0_i32_1 = arith.constant 0 : i32
    return %c0_i32, %c0_i32_0 : i32, i32
  }
  func.func @transform_2(%arg0: i32) -> (i32, i32) {
    %c0_i32 = arith.constant 0 : i32
    %c0_i32_0 = arith.constant 0 : i32
    %c0_i32_1 = arith.constant 0 : i32
    return %c0_i32, %c0_i32_0 : i32, i32
  }
  func.func @transform_3(%arg0: i32) -> (i32, i32, i32) {
    %c0_i32 = arith.constant 0 : i32
    %c0_i32_0 = arith.constant 0 : i32
    %c0_i32_1 = arith.constant 0 : i32
    return %arg0, %c0_i32, %c0_i32_0 : i32, i32, i32
  }
}

</mosaic_0001>

<bundles_post_ra>
// kernel: tpu_custom_call.1
= control target key start
LH: loop header
LB: loop body
LE: loop exit
PB: predicated region body
PF: predicated region fallthrough
CT: control target
= control target key end

     0   :  { %8 = vsyncpa [#allocation4], 0  ;;  %s962_s0 = inlined_call_operand.hbm [shape: f32[2,4,290], index: 0, kind: input, shape index: {}]   ;;  %s963_s1 = inlined_call_operand.vmem [shape: f32[8,36], index: 1, kind: input, shape index: {}]   ;;  %s964_s2 = inlined_call_operand.vmem [shape: f32[8,1], index: 2, kind: input, shape index: {}]   ;;  %s965_s3 = inlined_call_operand.vmem [shape: f32[2,12,256], index: 3, kind: output, shape index: {}]  }
   0x1   :  { %10 = vsyncpa [#allocation4 + $0x1], 0  ;;  %s774_s12 = smov 0   ;;  %s776_s13 = smov 0  }
   0x2   :  { %s778_s14 = smov 0   ;;  %s780_s15 = smov 0  }
   0x3 LB: > { %s793_s16 = sadd.s32 4294967295, %s741_s15   ;;  %s796_s17 = sadd.s32 1, %s741_s15   ;;  %s741_s15 = sphi %s780_s15, %s980_s15   ;;  %s737_s14 = sphi %s778_s14, %s979_s14   ;;  %s733_s13 = sphi %s776_s13, %s978_s13   ;;  %s729_s12 = sphi %s774_s12, %s977_s12  }
   0x4   : > { %s20_s18 = ssub.s32 %s741_s15, %s796_s17  ;;  %s23_s19 = sadd.s32 1, %s737_s14 }
   0x5   : > { %p21_p0 = scmp.eq.s32.totalorder %s20_s18, 0  ;;  %p30_p1 = scmp.ne.s32.totalorder %s737_s14, %s733_s13 }
   0x6   : > { %p31_p2 = scmp.eq.s32.totalorder %s741_s15, 0  ;;  %p36_p3 = scmp.ne.s32.totalorder %s733_s13, %s729_s12 }
   0x7   : > { %s806_s20 = scalar_select %p21_p0, %s737_s14, %s23_s19  }
   0x8   : > { %p32_p4 = por %p31_p2, %p30_p1  ;;  %p37_p5 = scmp.eq.s32.totalorder %s793_s16, 0 }
   0x9   : > { %p629_p6 = scmp.lt.s32.totalorder %s741_s15, 2  ;;  %s134_s22 = sand.u32 1, %s737_s14  }
   0xa   : > { %p810_p7 = por %p37_p5, %p36_p3  ;;  %s620_s23 = smul.u32 12, %s134_s22 }
   0xb   : > { %s621_s24 = smul.u32 192, %s741_s15  ;;  %p816_p8 = pnand %p629_p6, %p32_p4 }
   0xc   : > { %s138_s29 = scalar_lea.vmem [#allocation3], %s620_s23  ;;  %s135_s4 = scalar_lea.sflag [#allocation4], %s134_s22 }
   0xd   : > { %s824_s28 = scalar_lea.hbm %s962_s0, %s621_s24  ;;  %s146_s30 = sshll.u32 %s138_s29, 4  ;;  %s826_s30 = int_to_ptr.vmem [resolvable:$true] %s146_s30 }
   0xe   : > { %s677_s5 = scalar_lea.hbm %s824_s28, 192  ;;  %p679_p11 = pneg %p816_p8 }
   0xf   : > { %p678_p10 = scmp.ne.s32.totalorder %s824_s28, %s677_s5  ;;  %s682_s8 = scalar_lea.hbm %s962_s0, 384 }
  0x10   : > { %p683_p0 = scmp.lt.u32.totalorder %s824_s28, %s962_s0  ;;  %p684_p1 = scmp.lt.u32.totalorder %s682_s8, %s677_s5 }
  0x11   : > { %p680_p12 = pnand %p679_p11, %p678_p10  ;;  %p686_p3 = scmp.lt.u32.totalorder %s677_s5, %s824_s28 }
  0x12   : > { %p685_p2 = por %p684_p1, %p683_p0 }
  0x13   : > { %p681_p13 = pneg %p680_p12 }
  0x14   : > { %p687_p4 = por %p686_p3, %p685_p2 }
  0x16   : > { %p688_p5 = pnand %p687_p4, %p681_p13 }
  0x18   : > { %691 = shalt.err (!%p688_p5)
}
  0x19   : > { %s692_s11 = scalar_lea.vmem %s826_s30, 192  ;;  %s743_s12 = smov [#allocation3]  }
  0x1a   : > { %p693_p6 = scmp.ne.s32.totalorder %s826_s30, %s692_s11  ;;  %s697_s18 = sshll.u32 %s743_s12, 4  ;;  %s698_s18 = int_to_ptr.vmem [resolvable:$false] %s697_s18 }
  0x1b   : > { %s699_s19 = scalar_lea.vmem %s698_s18, 384  ;;  %p700_p9 = scmp.lt.s32.totalorder %s826_s30, %s698_s18 }
  0x1c   : > { %p695_p10 = pnand %p693_p6, %p679_p11  ;;  %p701_p0 = scmp.lt.s32.totalorder %s699_s19, %s692_s11 }
  0x1e   : > { %p696_p12 = pneg %p695_p10  ;;  %p702_p1 = por %p701_p0, %p700_p9 }
  0x20   : > { %p703_p2 = pnand %p702_p1, %p696_p12 }
  0x22   : > { %706 = shalt.err (!%p703_p2)
}
  0x23   : > { %628 = dma.hbm_to_vmem [thread:$0]  (!%p816_p8), %s824_s28, 192, %s826_s30, %s135_s4  }
  0x24   : > { %p151_p13 = scmp.lt.s32.totalorder %s741_s15, 3  ;;  %p968_p3 = scmp.ge.s32.totalorder %s741_s15, 1 }
  0x26   : > { %p152_p11 = pnand %p968_p3, %p151_p13 }
  0x27   : > { %s157_s22 = sand.u32 (!%p152_p11), 1, %s733_s13  }
  0x28   : > { %155 = sbr.rel (%p152_p11) target bundleno = 440 (0x1b8), region = 32  ;;  %s158_s24 = scalar_lea.sflag (!%p152_p11), [#allocation4], %s157_s22 }
  0x29   : > { %s622_s23 = smul.u32 (!%p152_p11), 12, %s157_s22 }
  0x2b   : > { %s857_s26 = scalar_lea.vmem (!%p152_p11), [#allocation3], %s622_s23 }
  0x2f   : > { %724 = dma.done.wait (%p810_p7), %s158_s24, 192  }
  0x30   : > { %726 = vsyncadd (%p810_p7), %s158_s24, 4294967104  ;;  %v189_v0 = vlaneseq  ;;  %v276_v5 = vld [vmem:[%s857_s26 + $0x8] sm:$0xf]  ;;  %v275_v6 = vld [vmem:[%s857_s26] sm:$0xff]  ;;  %s744_s15 = smov 112   ;;  %s745_s21 = smov 126  }
  0x31   : > { %284 = vrot.lane.b32.xlu0 %v276_v5, %s744_s15  ;;  %280 = vrot.lane.b32.xlu1 %v275_v6, %s744_s15  ;;  %v279_v9 = vcombine.high %v275_v6, %v275_v6  ;;  %v252_v10 = vld [vmem:[%s857_s26 + $0x8] sm:$0xf]  ;;  %s746_s25 = smov 127   ;;  %v236_v14 = vcombine.low %v275_v6, %v275_v6  ;;  %s747_s27 = smov 110   ;;  %v752_v20 = vmov 0.0   ;;  %v753_v21 = vmov 0  }
  0x32   : > { %v863_v1 = vand.u32 127, %v189_v0  ;;  %v675_v13 = vld [vmem:[%s857_s26 + $0x8] ss:$0 sps:$4 sm:$0xff]   ;;  %s748_s28 = smov 96   ;;  %s749_s29 = smov 111   ;;  %496 = vmatprep.mubr.f32.mxu0 %v752_v20  ;;  %672 = vset.pattern.permute.xlu0 %v753_v21  ;;  %vm286_vm2 = vcmask 916480  }
  0x33   : > { %v320_v15 = vld [vmem:[%s857_s26 + $0x8] sm:$0xf]  ;;  %s750_s30 = smov 95   ;;  %s751_s4 = smov 94   ;;  %vm266_vm3 = vcmask 1031168   ;;  %vm244_vm5 = vcmask 1039360  }
  0x34   : > { %v866_v2 = vadd.s32 128, %v863_v1  ;;  %v196_v3 = vand.u32 15, %v863_v1  ;;  %v346_v16 = vld [vmem:[%s857_s26 + $0x8] sm:$0xf]  ;;  %vm330_vm7 = vcmask 900096   ;;  %vm356_vm8 = vcmask 785408  }
  0x35   : > { %264 = vrot.lane.b32.xlu0 %v252_v10, %s745_s21  ;;  %240 = vrot.lane.b32.xlu1 %v275_v6, %s746_s25  ;;  %v302_v17 = vld [vmem:[%s857_s26 + $0x8] sm:$0xf]  ;;  %vm312_vm9 = vcmask 908288   ;;  %vm377_vm10 = vcmask 777216   ;;  %vm395_vm11 = vcmask 769024   ;;  %vm425_vm12 = vcmask 1043456  }
  0x36   : > { %v203_v4 = vand.u32 15, %v866_v2  ;;  %vm874_vm0 = vcmp.ne.s32.totalorder %v196_v3, 0  ;;  %v676_v18 = vld [vmem:[%s857_s26 + $0x8] ss:$0 sps:$4 sm:$0xff]   ;;  %vm914_vm6 = vcmp.ne.s32.totalorder %v196_v3, 15  ;;  %vm421_vm13 = vcmask 293888  }
  0x37   : > { %v228_v8 = vsel %vm874_vm0, %v275_v6, 0.0  ;;  %v385_v19 = vld [vmem:[%s857_s26 + $0x8] sm:$0xf]  ;;  %p184_p7 = scmp.lt.s32.totalorder %s793_s16, 1 }
  0x38   : > { %230 = vst [vmem:[#allocation2] sm:$0xf] %v228_v8  ;;  %vm883_vm1 = vcmp.ne.s32.totalorder %v203_v4, 0  ;;  %v415_v22 = vld [vmem:[%s964_s2] sm:$0xff]  ;;  %vm901_vm4 = vcmp.ne.s32.totalorder %v203_v4, 15 }
  0x39   : > { %v229_v12 = vsel %vm883_vm1, %v279_v9, 0.0  ;;  %282 = vrot.lane.b32.xlu0 %v279_v9, %s744_s15  ;;  %262 = vrot.lane.b32.xlu1 %v279_v9, %s745_s21  ;;  %v506_v23 = vld [vmem:[%s857_s26 + $0x8] sm:$0xf]  ;;  %s982_s16 = smov (!%p184_p7, %s793_s16), 1 }
  0x3a   : > { %231 = vst [vmem:[#allocation2 + $0x8] sm:$0xf] %v229_v12  ;;  %s611_s9 = sshll.u32 %s982_s16, 5 }
  0x3b   : > { %s188_s12 = scalar_lea.vmem %s965_s3, %s611_s9 }
  0x3d   : > { %242 = vrot.lane.b32.xlu0 %v675_v13, %s746_s25  ;;  %260 = vrot.lane.b32.xlu1 %v275_v6, %s745_s21 }
  0x41   : > { %326 = vrot.lane.b32.xlu1 %v279_v9, %s747_s27  ;;  %238 = vrot.lane.b32.xlu0 %v236_v14, %s746_s25 }
  0x45   : > { %324 = vrot.lane.b32.xlu1 %v275_v6, %s747_s27  ;;  %328 = vrot.lane.b32.xlu0 %v320_v15, %s747_s27 }
  0x49   : > { %354 = vrot.lane.b32.xlu1 %v346_v16, %s748_s28  ;;  %352 = vrot.lane.b32.xlu0 %v279_v9, %s748_s28 }
  0x4d   : > { %310 = vrot.lane.b32.xlu1 %v302_v17, %s749_s29  ;;  %308 = vrot.lane.b32.xlu0 %v279_v9, %s749_s29 }
  0x51   : > { %373 = vrot.lane.b32.xlu1 %v275_v6, %s750_s30  ;;  %350 = vrot.lane.b32.xlu0 %v275_v6, %s748_s28 }
  0x55   : > { %306 = vrot.lane.b32.xlu1 %v275_v6, %s749_s29  ;;  %375 = vrot.lane.b32.xlu0 %v676_v18, %s750_s30 }
  0x59   : > { %391 = vrot.lane.b32.xlu1 %v279_v9, %s751_s4  ;;  %371 = vrot.lane.b32.xlu0 %v236_v14, %s750_s30 }
  0x5d   : > { %389 = vrot.lane.b32.xlu1 %v275_v6, %s751_s4  ;;  %393 = vrot.lane.b32.xlu0 %v385_v19, %s751_s4 }
  0x61   : > { %418 = vperm.xlu0 %672, %v415_v22   ;;  %510 = vrot.lane.b32.xlu1 %v275_v6, %s749_s29 }
  0x65   : > { %512 = vrot.lane.b32.xlu1 %v279_v9, %s749_s29  ;;  %514 = vrot.lane.b32.xlu0 %v506_v23, %s749_s29 }
  0xa3   : > { %v285_v24 = vpop.permute.xlu0 %284  ;;  %v281_v25 = vpop.permute.xlu1 %280 }
  0xa7   : > { %v265_v26 = vpop.permute.xlu0 %264  ;;  %v241_v27 = vpop.permute.xlu1 %240 }
  0xab   : > { %v283_v29 = vpop.permute.xlu0 %282  ;;  %v263_v30 = vpop.permute.xlu1 %262 }
  0xac   : > { %v287_v31 = vsel %vm286_vm2, %v281_v25, %v283_v29  ;;  %v288_v32 = vsel %vm286_vm2, %v283_v29, %v285_v24  ;;  %v268_v33 = vsel %vm266_vm3, %v263_v30, %v265_v26 }
  0xad   : > { %v291_v34 = vsel %vm874_vm0, %v287_v31, 0.0  ;;  %v292_v35 = vsel %vm883_vm1, %v288_v32, 0.0  ;;  %v272_v36 = vsel %vm901_vm4, %v268_v33, 0.0  ;;  %v404_v31 = vld [vmem:[%s963_s1] sm:$0xff] }
  0xae   : > { %v295_v37 = vrot.slane %v291_v34, 4  ;;  %v296_v38 = vrot.slane %v292_v35, 4  ;;  %274 = vst [vmem:[#allocation2 + $0x18] sm:$0xf] %v272_v36 }
  0xaf   : > { %v243_v40 = vpop.permute.xlu0 %242  ;;  %v261_v41 = vpop.permute.xlu1 %260 }
  0xb0   : > { %299 = vst [vmem:[#allocation2 + $0x10] sm:$0xf0] %v295_v37  ;;  %300 = vst [vmem:[#allocation2 + $0x18] sm:$0xf0] %v296_v38  ;;  %v246_v42 = vsel %vm244_vm5, %v241_v27, %v243_v40  ;;  %v267_v43 = vsel %vm266_vm3, %v261_v41, %v263_v30 }
  0xb1   : > { %250 = vst [vmem:[#allocation2 + $0x8] sm:$0xf0] %v246_v42  ;;  %v271_v44 = vsel %vm914_vm6, %v267_v43, 0.0 }
  0xb2   : > { %273 = vst [vmem:[#allocation2 + $0x10] sm:$0xf] %v271_v44 }
  0xb3   : > { %v327_v45 = vpop.permute.xlu1 %326  ;;  %v239_v46 = vpop.permute.xlu0 %238 }
  0xb4   : > { %v245_v47 = vsel %vm244_vm5, %v239_v46, %v241_v27 }
  0xb5   : > { %249 = vst [vmem:[#allocation2] sm:$0xf0] %v245_v47 }
  0xb7   : > { %v325_v48 = vpop.permute.xlu1 %324  ;;  %v329_v49 = vpop.permute.xlu0 %328  ;;  %v408_v50 = vld [vmem:[#allocation2 + $0x18] sm:$0xff] }
  0xb8   : > { %v331_v51 = vsel %vm330_vm7, %v325_v48, %v327_v45  ;;  %v332_v52 = vsel %vm330_vm7, %v327_v45, %v329_v49  ;;  %v406_v53 = vld [vmem:[#allocation2 + $0x8] sm:$0xff] }
  0xb9   : > { %v335_v54 = vsel %vm914_vm6, %v331_v51, 0.0  ;;  %v336_v55 = vsel %vm901_vm4, %v332_v52, 0.0  ;;  %v612_v56 = vpack.c.bf16 %v408_v50, %v406_v53  ;;  %v407_v63 = vld [vmem:[#allocation2 + $0x10] sm:$0xff] }
  0xba   : > { %v339_v57 = vrot.slane %v335_v54, 4  ;;  %v340_v58 = vrot.slane %v336_v55, 4 }
  0xbb   : > { %v355_v59 = vpop.permute.xlu1 %354  ;;  %v353_v60 = vpop.permute.xlu0 %352  ;;  %613 = vmatprep.subr.bf16.mxu0 %v612_v56 }
  0xbc   : > { %343 = vst [vmem:[#allocation2 + $0x20] sm:$0xf0] %v339_v57  ;;  %344 = vst [vmem:[#allocation2 + $0x28] sm:$0xf0] %v340_v58  ;;  %v358_v61 = vsel %vm356_vm8, %v353_v60, %v355_v59  ;;  %v405_v62 = vld [vmem:[#allocation2] sm:$0xff] }
  0xbd   : > { %v362_v0 = vsel %vm883_vm1, %v358_v61, 0.0  ;;  %v614_v1 = vpack.c.bf16 %v407_v63, %v405_v62 }
  0xbe   : > { %364 = vst [vmem:[#allocation2 + $0x38] sm:$0xf] %v362_v0 }
  0xbf   : > { %v311_v2 = vpop.permute.xlu1 %310  ;;  %v309_v3 = vpop.permute.xlu0 %308  ;;  %615 = vmatpush1.bf16.msra.mxu0 %v614_v1 }
  0xc0   : > { %v314_v4 = vsel %vm312_vm9, %v309_v3, %v311_v2 }
  0xc1   : > { %318 = vst [vmem:[#allocation2 + $0x28] sm:$0xf] %v314_v4 }
  0xc3   : > { %v374_v5 = vpop.permute.xlu1 %373  ;;  %v351_v6 = vpop.permute.xlu0 %350 }
  0xc4   : > { %v357_v8 = vsel %vm356_vm8, %v351_v6, %v353_v60 }
  0xc5   : > { %v361_v9 = vsel %vm874_vm0, %v357_v8, 0.0 }
  0xc6   : > { %363 = vst [vmem:[#allocation2 + $0x30] sm:$0xf] %v361_v9 }
  0xc7   : > { %v307_v10 = vpop.permute.xlu1 %306  ;;  %v376_v11 = vpop.permute.xlu0 %375 }
  0xc8   : > { %v313_v12 = vsel %vm312_vm9, %v307_v10, %v309_v3  ;;  %v379_v13 = vsel %vm377_vm10, %v374_v5, %v376_v11  ;;  %v410_v7 = vld [vmem:[#allocation2 + $0x28] sm:$0xff] }
  0xc9   : > { %317 = vst [vmem:[#allocation2 + $0x20] sm:$0xf] %v313_v12  ;;  %383 = vst [vmem:[#allocation2 + $0x38] sm:$0xf0] %v379_v13 }
  0xcb   : > { %v392_v14 = vpop.permute.xlu1 %391  ;;  %v372_v15 = vpop.permute.xlu0 %371 }
  0xcc   : > { %v378_v16 = vsel %vm377_vm10, %v372_v15, %v374_v5 }
  0xcd   : > { %382 = vst [vmem:[#allocation2 + $0x30] sm:$0xf0] %v378_v16 }
  0xcf   : > { %v390_v17 = vpop.permute.xlu1 %389  ;;  %v394_v18 = vpop.permute.xlu0 %393 }
  0xd0   : > { %v396_v19 = vsel %vm395_vm11, %v390_v17, %v392_v14  ;;  %v397_v20 = vsel %vm395_vm11, %v392_v14, %v394_v18  ;;  %v412_v21 = vld [vmem:[#allocation2 + $0x38] sm:$0xff]  ;;  %v409_v25 = vld [vmem:[#allocation2 + $0x20] sm:$0xff] }
  0xd1   : > { %v400_v22 = vsel %vm914_vm6, %v396_v19, 0.0  ;;  %v401_v23 = vsel %vm901_vm4, %v397_v20, 0.0  ;;  %v616_v24 = vpack.c.bf16 %v412_v21, %v410_v7 }
  0xd2   : > { %402 = vst [vmem:[#allocation2 + $0x40] sm:$0xf] %v400_v22  ;;  %403 = vst [vmem:[#allocation2 + $0x48] sm:$0xf] %v401_v23 }
  0xd3   : > { %617 = vmatprep.subr.bf16.mxu0 %v616_v24  ;;  %v511_v28 = vpop.permute.xlu1 %510 }
  0xd4   : > { %v411_v26 = vld [vmem:[#allocation2 + $0x30] sm:$0xff] }
  0xd5   : > { %v618_v27 = vpack.c.bf16 %v411_v26, %v409_v25 }
  0xd7   : > { %619 = vmatpush1.bf16.msra.mxu0 %v618_v27  ;;  %v513_v33 = vpop.permute.xlu1 %512 }
  0xd8   : > { %v516_v34 = vsel %vm312_vm9, %v511_v28, %v513_v33 }
  0xd9   : > { %v414_v29 = vld [vmem:[#allocation2 + $0x48] sm:$0xf]  ;;  %v413_v30 = vld [vmem:[#allocation2 + $0x40] sm:$0xf]  ;;  %520 = vst [vmem:[%s188_s12] sm:$0xf] %v516_v34 }
  0xda   : > { %606 = vmatprep.subr.msk.mxu0 %vm425_vm12, %v414_v29 }
  0xdb   : > { %607 = vmatpush1.msk.msra.mxu0 %vm425_vm12, %v413_v30 }
  0xdc   : > { %608 = vmatmul.mubr.msk.f32.vlgmr.msra.gmra.mrb[0].mxu0 %vm421_vm13, %v404_v31 }
  0xe0   : > { %v419_v32 = vpop.permute.xlu0 %418 }
  0xe4   : > { %v515_v35 = vpop.permute.xlu0 %514 }
  0xe5   : > { %v517_v36 = vsel %vm312_vm9, %v513_v33, %v515_v35 }
  0xe6   : > { %521 = vst [vmem:[%s188_s12 + $0x8] sm:$0xf] %v517_v36 }
 0x1af   : > { %v498_v37 = vpop.f32.mrb[0].mxu0 }
 0x1b0   : > { %v499_v38 = vadd.f32 %v498_v37, %v419_v32  ;;  %v500_v39 = vpop.f32.mrb[1].mxu0 }
 0x1b1   : > { %v501_v40 = vadd.f32 %v500_v39, %v419_v32 }
 0x1b2   : > { %v503_v41 = vmax.f32 %v499_v38, 0.0 }
 0x1b3   : > { %v504_v42 = vmax.f32 %v501_v40, 0.0 }
 0x1b4   : > { %v524_v43 = vrot.slane %v503_v41, 4 }
 0x1b5   : > { %v525_v44 = vrot.slane %v504_v42, 4 }
 0x1b6   : > { %528 = vst [vmem:[%s188_s12 + $0x10] ss:$-12 sps:$4 sm:$0xff] %v524_v43  }
 0x1b7   : > { %529 = vst [vmem:[%s188_s12 + $0x18] ss:$-12 sps:$4 sm:$0xff] %v525_v44  }
 0x1b8 PF: > { %p13_p8 = scmp.ge.s32.totalorder %s796_s17, 4   ;;  %s977_s12 = smov %s733_s13 }
 0x1b9   : > { %s978_s13 = smov %s737_s14  ;;  %s979_s14 = smov %s806_s20 }
 0x1ba   : > { %s980_s15 = smov %s796_s17  ;;  %15 = sbr.rel (!%p13_p8) target bundleno = 3 (0x3), region = 72 }
 0x1c1   :  { %553 = vsyncpa [#allocation4], 1 }
 0x1c2   :  { %555 = vsyncpa [#allocation4 + $0x1], 1 }

</bundles_post_ra>
